<compile_context>
chip_gen: v7x
topology: tpu7x:2x2x1
jax: 0.10.0
libtpu: 0.0.40
codegen_flags: <defaults>
</compile_context>

<pallas_src>
import math

import jax
import jax.numpy as jnp
from jax.experimental import pallas as pl
from jax.experimental.pallas import tpu as pltpu

# ------------------------- problem sizes -------------------------
B = 8        # batch
D = 16       # input feature dim  (== input_size of the PyTorch module)
S = 8        # seasonal feature dim
H = 32       # hidden width of encoder/decoder MLPs
Z = 8        # latent dim
INPUT_SIZE = D
LANES = 128  # TPU lane width

LOG_2PI = math.log(2.0 * math.pi)

# ---- activation-slab lane layout (eps first -> lane-aligned reparam FMA) ----
A_E = 0          # eps      lanes [0, Z)
A_X = Z          # x        lanes [Z, Z+D)
A_S = Z + D      # seasonal lanes [Z+D, Z+D+S)

# ---- packed weight-slab layout: five (128,128) blocks + one 16-row bias tile ----
KROWS = 128
R_W_ENC1 = 0            # rows match activation lanes: x rows A_X.., seas rows A_S.., eps rows 0
R_W_MEAN = 1 * KROWS    # rows 0:H = Wem, cols 0:Z
R_W_LVAR = 2 * KROWS    # rows 0:H = Wev, cols 0:Z
R_W_DEC1 = 3 * KROWS    # rows 0:Z = Wd1z, rows A_S:A_S+S = Wd1s, cols 0:H
R_W_DEC2 = 4 * KROWS    # rows 0:H = Wd2, cols 0:D
R_BIAS = 5 * KROWS      # 16 bias rows: [b_enc1, b_mean, b_lvar, b_dec1, b_dec2, 0...]
W_ROWS = R_BIAS + 16    # 656


# ------------------------- Pallas kernel -------------------------
def vae_kernel(act_ref, w_ref, nlv_ref, recon_ref, loss_ref):
    acts = act_ref[...]                                 # (B, 128) f32, one vreg
    acts_bf = acts.astype(jnp.bfloat16)
    bias = w_ref[R_BIAS:R_BIAS + 16, :].astype(jnp.float32)   # (16, 128)

    # ---- encoder layer 1: full-width push, weight rows match activation lanes ----
    h = jnp.tanh(
        jnp.dot(acts_bf, w_ref[R_W_ENC1:R_W_ENC1 + KROWS, :],
                preferred_element_type=jnp.float32) + bias[0:1, :]
    )                                                   # (B,128); lanes H: are exactly 0
    h_bf = h.astype(jnp.bfloat16)

    # ---- encoder layer 2: two pushes so mean and log-var both land at lanes 0:Z ----
    z_mean = jnp.dot(h_bf, w_ref[R_W_MEAN:R_W_MEAN + KROWS, :],
                     preferred_element_type=jnp.float32) + bias[1:2, :]
    z_lvar = jnp.dot(h_bf, w_ref[R_W_LVAR:R_W_LVAR + KROWS, :],
                     preferred_element_type=jnp.float32) + bias[2:3, :]

    # ---- reparameterization: lane-aligned FMA (eps sits at lanes 0:Z of acts) ----
    s = jnp.exp(0.5 * z_lvar)          # lanes Z: of z_lvar are exactly 0 -> s == 1 there
    z_full = z_mean + s * acts         # lanes 0:Z = z ; seasonal lanes pass through as-is

    # ---- decoder layer 1: ONE full-width push (no [z|seasonal] concatenate) ----
    hd = jnp.tanh(
        jnp.dot(z_full.astype(jnp.bfloat16), w_ref[R_W_DEC1:R_W_DEC1 + KROWS, :],
                preferred_element_type=jnp.float32) + bias[3:4, :]
    )                                                   # (B,128); lanes H: are 0

    # ---- decoder layer 2: result is already the lane-dense (B,128) recon slab ----
    recon_full = jnp.dot(hd.astype(jnp.bfloat16), w_ref[R_W_DEC2:R_W_DEC2 + KROWS, :],
                         preferred_element_type=jnp.float32) + bias[4:5, :]
    recon_ref[...] = recon_full                         # unmasked full-vreg store

    # ---- recon loss: Gaussian log-likelihood sum / input_size (reordered math) ----
    nlv = nlv_ref[0, 0]
    diff = acts[:, A_X:A_X + D] - recon_full[:, 0:D]    # (B, D), off the store path
    quad = jnp.sum(diff * diff)                         # scalar
    inv_var = jnp.exp(jnp.full((1, 1), -nlv, jnp.float32))  # single EUP op
    quad_scaled = jnp.sum(quad * inv_var)               # scalar * (1,1) -> scalar
    log_lik = -0.5 * (quad_scaled + float(B * D) * (LOG_2PI + nlv))
    loss_ref[0] = log_lik * (1.0 / float(INPUT_SIZE))

    # ---- KL divergence to N(0, I), averaged over batch ----
    # Padded lanes contribute 1 + 0 - 0 - exp(0) = 0 exactly -> full-vreg reduce.
    kl = -0.5 * jnp.sum(1.0 + z_lvar - z_mean * z_mean - s * s) * (1.0 / float(B))
    loss_ref[1] = kl


# ------------------------- host-side packing -------------------------
def pack_weight_slab(params):
    """All weights/biases into one (W_ROWS, 128) bf16 slab (packed once)."""
    (ew1x, ew1s, eb1, ewm, ebm, ewv, ebv,
     dw1z, dw1s, db1, dw2, db2, _nlv) = params

    slab = jnp.zeros((W_ROWS, LANES), jnp.float32)
    # encoder layer 1: rows laid out to match activation lanes (eps rows stay 0)
    slab = slab.at[R_W_ENC1 + A_X:R_W_ENC1 + A_X + D, 0:H].set(ew1x)
    slab = slab.at[R_W_ENC1 + A_S:R_W_ENC1 + A_S + S, 0:H].set(ew1s)
    # encoder layer 2 (split mean / log-var, both outputs at lanes 0:Z)
    slab = slab.at[R_W_MEAN:R_W_MEAN + H, 0:Z].set(ewm)
    slab = slab.at[R_W_LVAR:R_W_LVAR + H, 0:Z].set(ewv)
    # decoder layer 1: z rows at 0:Z, seasonal rows at A_S (x lanes stay 0)
    slab = slab.at[R_W_DEC1 + A_E:R_W_DEC1 + A_E + Z, 0:H].set(dw1z)
    slab = slab.at[R_W_DEC1 + A_S:R_W_DEC1 + A_S + S, 0:H].set(dw1s)
    # decoder layer 2
    slab = slab.at[R_W_DEC2:R_W_DEC2 + H, 0:D].set(dw2)
    # biases
    slab = slab.at[R_BIAS + 0, 0:H].set(eb1[0])
    slab = slab.at[R_BIAS + 1, 0:Z].set(ebm[0])
    slab = slab.at[R_BIAS + 2, 0:Z].set(ebv[0])
    slab = slab.at[R_BIAS + 3, 0:H].set(db1[0])
    slab = slab.at[R_BIAS + 4, 0:D].set(db2[0])
    return slab.astype(jnp.bfloat16)


# ------------------------- wrapper -------------------------
@jax.jit
def vae_forward(x, seasonal, eps, w_slab, noise_log_var):
    # Single fused concatenate -> one lane-dense (B, 128) activation vreg.
    pad = jnp.zeros((B, LANES - (Z + D + S)), jnp.float32)
    acts = jnp.concatenate([eps, x, seasonal, pad], axis=-1)
    nlv = noise_log_var.reshape(1, 1)   # conventional (1,1) SMEM scalar

    recon_full, losses = pl.pallas_call(
        vae_kernel,
        in_specs=[
            pl.BlockSpec(memory_space=pltpu.MemorySpace.VMEM),  # activation slab
            pl.BlockSpec(memory_space=pltpu.MemorySpace.VMEM),  # bf16 weight slab
            pl.BlockSpec(memory_space=pltpu.MemorySpace.SMEM),  # noise_log_var
        ],
        out_specs=(
            pl.BlockSpec(memory_space=pltpu.MemorySpace.VMEM),  # recon slab (lane-dense)
            pl.BlockSpec(memory_space=pltpu.MemorySpace.SMEM),  # [recon_loss, kl]
        ),
        out_shape=(
            jax.ShapeDtypeStruct((B, LANES), jnp.float32),
            jax.ShapeDtypeStruct((2,), jnp.float32),
        ),
    )(acts, w_slab, nlv)
    return recon_full[:, :D], losses[0], losses[1]


# ------------------------- reference (pure JAX, f32) -------------------------
def _hdot(a, b):
    return jnp.dot(a, b, precision=jax.lax.Precision.HIGHEST)


def vae_reference(x, seasonal, eps, params):
    (ew1x, ew1s, eb1, ewm, ebm, ewv, ebv,
     dw1z, dw1s, db1, dw2, db2, nlv) = params
    h = jnp.tanh(_hdot(x, ew1x) + _hdot(seasonal, ew1s) + eb1)
    z_mean = _hdot(h, ewm) + ebm
    z_log_var = _hdot(h, ewv) + ebv
    z = z_mean + jnp.exp(0.5 * z_log_var) * eps
    hd = jnp.tanh(_hdot(z, dw1z) + _hdot(seasonal, dw1s) + db1)
    recon = _hdot(hd, dw2) + db2
    diff = x - recon
    log_lik = -0.5 * jnp.sum(LOG_2PI + nlv[0] + diff * diff * jnp.exp(-nlv[0]))
    rloss = log_lik / INPUT_SIZE
    kl = -0.5 * jnp.sum(1.0 + z_log_var - z_mean ** 2 - jnp.exp(z_log_var)) / B
    return recon, rloss, kl


def init_params(key):
    ks = jax.random.split(key, 8)
    scale = 0.1

    def w(k, shape):
        return scale * jax.random.normal(k, shape, dtype=jnp.float32)

    ew1x = w(ks[0], (D, H))
    ew1s = w(ks[1], (S, H))
    eb1 = jnp.zeros((1, H), jnp.float32)
    ewm = w(ks[2], (H, Z))
    ebm = jnp.zeros((1, Z), jnp.float32)
    ewv = w(ks[3], (H, Z))
    ebv = jnp.zeros((1, Z), jnp.float32)
    dw1z = w(ks[4], (Z, H))
    dw1s = w(ks[5], (S, H))
    db1 = jnp.zeros((1, H), jnp.float32)
    dw2 = w(ks[6], (H, D))
    db2 = jnp.zeros((1, D), jnp.float32)
    nlv = jnp.zeros((1,), jnp.float32)   # noise_log_var = nn.Parameter(torch.zeros(1))
    return (ew1x, ew1s, eb1, ewm, ebm, ewv, ebv,
            dw1z, dw1s, db1, dw2, db2, nlv)


if __name__ == "__main__":
    key = jax.random.PRNGKey(0)
    k_x, k_s, k_eps, k_p = jax.random.split(key, 4)

    x = jax.random.normal(k_x, (B, D), dtype=jnp.float32)
    seasonal = jax.random.normal(k_s, (B, S), dtype=jnp.float32)
    # eps ~ randn_like(z_mean) for the reparameterization trick (explicit input)
    eps = jax.random.normal(k_eps, (B, Z), dtype=jnp.float32)

    params = init_params(k_p)
    w_slab = pack_weight_slab(params)          # packed once (amortized)
    nlv = params[-1]

    recon, recon_loss, kl_loss = jax.block_until_ready(
        vae_forward(x, seasonal, eps, w_slab, nlv)
    )

    assert recon.shape == (B, D)
    assert recon_loss.shape == () and kl_loss.shape == ()
    assert jnp.isfinite(recon).all()
    assert jnp.isfinite(recon_loss) and jnp.isfinite(kl_loss)

    # correctness vs. pure-JAX f32 reference (kernel uses bf16 MXU operands,
    # so allow bf16-level tolerance)
    r_recon, r_rloss, r_kl = vae_reference(x, seasonal, eps, params)
    assert jnp.allclose(recon, r_recon, atol=2e-2, rtol=2e-2)
    assert jnp.allclose(recon_loss, r_rloss, atol=2e-2, rtol=2e-2)
    assert jnp.allclose(kl_loss, r_kl, atol=2e-2, rtol=2e-2)

    print("KERNEL_OK")
</pallas_src>

<mosaic_0001>
module attributes {stable_mosaic.version = 11 : i64} {
  func.func @vae_kernel(%arg0: memref<8x128xf32, #tpu.memory_space<vmem>>, %arg1: memref<656x128xbf16, #tpu.memory_space<vmem>>, %arg2: memref<1x1xf32, #tpu.memory_space<smem>>, %arg3: memref<8x128xf32, #tpu.memory_space<vmem>>, %arg4: memref<2xf32, #tpu.memory_space<smem>>) attributes {dimension_semantics = [], scalar_prefetch = 0 : i64, scratch_operands = 0 : i64, tpu.core_type = #tpu.core_type<tc>} {
    %c0 = arith.constant 0 : index
    %c0_0 = arith.constant 0 : index
    %0 = vector.load %arg0[%c0, %c0_0] : memref<8x128xf32, #tpu.memory_space<vmem>>, vector<8x128xf32>
    %1 = arith.truncf %0 : vector<8x128xf32> to vector<8x128xbf16>
    %c640 = arith.constant 640 : index
    %c0_1 = arith.constant 0 : index
    %2 = vector.load %arg1[%c640, %c0_1] : memref<656x128xbf16, #tpu.memory_space<vmem>>, vector<16x128xbf16>
    %3 = arith.extf %2 : vector<16x128xbf16> to vector<16x128xf32>
    %c0_2 = arith.constant 0 : index
    %c0_3 = arith.constant 0 : index
    %4 = vector.load %arg1[%c0_2, %c0_3] : memref<656x128xbf16, #tpu.memory_space<vmem>>, vector<128x128xbf16>
    %cst = arith.constant dense<0.000000e+00> : vector<8x128xf32>
    %5 = tpu.matmul %1, %4, %cst {dimension_numbers = #tpu.dot_dimension_numbers<[1], [0], [0], [1], [0, 0, 1, 1], [], []>} : vector<8x128xbf16>, vector<128x128xbf16>, vector<8x128xf32> -> vector<8x128xf32>
    %6 = vector.extract_strided_slice %3 {offsets = [0, 0], sizes = [1, 128], strides = [1, 1]} : vector<16x128xf32> to vector<1x128xf32>
    %7 = vector.broadcast %6 : vector<1x128xf32> to vector<8x128xf32>
    %8 = arith.addf %5, %7 : vector<8x128xf32>
    %9 = math.tanh %8 : vector<8x128xf32>
    %10 = arith.truncf %9 : vector<8x128xf32> to vector<8x128xbf16>
    %c128 = arith.constant 128 : index
    %c0_4 = arith.constant 0 : index
    %11 = vector.load %arg1[%c128, %c0_4] : memref<656x128xbf16, #tpu.memory_space<vmem>>, vector<128x128xbf16>
    %cst_5 = arith.constant dense<0.000000e+00> : vector<8x128xf32>
    %12 = tpu.matmul %10, %11, %cst_5 {dimension_numbers = #tpu.dot_dimension_numbers<[1], [0], [0], [1], [0, 0, 1, 1], [], []>} : vector<8x128xbf16>, vector<128x128xbf16>, vector<8x128xf32> -> vector<8x128xf32>
    %13 = vector.extract_strided_slice %3 {offsets = [1, 0], sizes = [1, 128], strides = [1, 1]} : vector<16x128xf32> to vector<1x128xf32>
    %14 = vector.broadcast %13 : vector<1x128xf32> to vector<8x128xf32>
    %15 = arith.addf %12, %14 : vector<8x128xf32>
    %c256 = arith.constant 256 : index
    %c0_6 = arith.constant 0 : index
    %16 = vector.load %arg1[%c256, %c0_6] : memref<656x128xbf16, #tpu.memory_space<vmem>>, vector<128x128xbf16>
    %cst_7 = arith.constant dense<0.000000e+00> : vector<8x128xf32>
    %17 = tpu.matmul %10, %16, %cst_7 {dimension_numbers = #tpu.dot_dimension_numbers<[1], [0], [0], [1], [0, 0, 1, 1], [], []>} : vector<8x128xbf16>, vector<128x128xbf16>, vector<8x128xf32> -> vector<8x128xf32>
    %18 = vector.extract_strided_slice %3 {offsets = [2, 0], sizes = [1, 128], strides = [1, 1]} : vector<16x128xf32> to vector<1x128xf32>
    %19 = vector.broadcast %18 : vector<1x128xf32> to vector<8x128xf32>
    %20 = arith.addf %17, %19 : vector<8x128xf32>
    %cst_8 = arith.constant 5.000000e-01 : f32
    %21 = vector.broadcast %cst_8 : f32 to vector<8x128xf32>
    %22 = arith.mulf %21, %20 : vector<8x128xf32>
    %23 = math.exp %22 : vector<8x128xf32>
    %24 = arith.mulf %23, %0 : vector<8x128xf32>
    %25 = arith.addf %15, %24 : vector<8x128xf32>
    %26 = arith.truncf %25 : vector<8x128xf32> to vector<8x128xbf16>
    %c384 = arith.constant 384 : index
    %c0_9 = arith.constant 0 : index
    %27 = vector.load %arg1[%c384, %c0_9] : memref<656x128xbf16, #tpu.memory_space<vmem>>, vector<128x128xbf16>
    %cst_10 = arith.constant dense<0.000000e+00> : vector<8x128xf32>
    %28 = tpu.matmul %26, %27, %cst_10 {dimension_numbers = #tpu.dot_dimension_numbers<[1], [0], [0], [1], [0, 0, 1, 1], [], []>} : vector<8x128xbf16>, vector<128x128xbf16>, vector<8x128xf32> -> vector<8x128xf32>
    %29 = vector.extract_strided_slice %3 {offsets = [3, 0], sizes = [1, 128], strides = [1, 1]} : vector<16x128xf32> to vector<1x128xf32>
    %30 = vector.broadcast %29 : vector<1x128xf32> to vector<8x128xf32>
    %31 = arith.addf %28, %30 : vector<8x128xf32>
    %32 = math.tanh %31 : vector<8x128xf32>
    %33 = arith.truncf %32 : vector<8x128xf32> to vector<8x128xbf16>
    %c512 = arith.constant 512 : index
    %c0_11 = arith.constant 0 : index
    %34 = vector.load %arg1[%c512, %c0_11] : memref<656x128xbf16, #tpu.memory_space<vmem>>, vector<128x128xbf16>
    %cst_12 = arith.constant dense<0.000000e+00> : vector<8x128xf32>
    %35 = tpu.matmul %33, %34, %cst_12 {dimension_numbers = #tpu.dot_dimension_numbers<[1], [0], [0], [1], [0, 0, 1, 1], [], []>} : vector<8x128xbf16>, vector<128x128xbf16>, vector<8x128xf32> -> vector<8x128xf32>
    %36 = vector.extract_strided_slice %3 {offsets = [4, 0], sizes = [1, 128], strides = [1, 1]} : vector<16x128xf32> to vector<1x128xf32>
    %37 = vector.broadcast %36 : vector<1x128xf32> to vector<8x128xf32>
    %38 = arith.addf %35, %37 : vector<8x128xf32>
    %c0_13 = arith.constant 0 : index
    %c0_14 = arith.constant 0 : index
    %39 = vector.load %arg3[%c0_13, %c0_14] : memref<8x128xf32, #tpu.memory_space<vmem>>, vector<8x128xf32>
    tpu.vector_store %arg3[%c0_13, %c0_14], %38 {strides = array<i32>} : memref<8x128xf32, #tpu.memory_space<vmem>>, vector<8x128xf32>,
    %c0_15 = arith.constant 0 : index
    %c0_16 = arith.constant 0 : index
    %40 = memref.load %arg2[%c0_15, %c0_16] : memref<1x1xf32, #tpu.memory_space<smem>>
    %41 = vector.extract_strided_slice %0 {offsets = [0, 8], sizes = [8, 16], strides = [1, 1]} : vector<8x128xf32> to vector<8x16xf32>
    %42 = vector.extract_strided_slice %38 {offsets = [0, 0], sizes = [8, 16], strides = [1, 1]} : vector<8x128xf32> to vector<8x16xf32>
    %43 = arith.subf %41, %42 : vector<8x16xf32>
    %44 = arith.mulf %43, %43 : vector<8x16xf32>
    %45 = vector.shape_cast %44 : vector<8x16xf32> to vector<1x8x16xf32>
    %cst_17 = arith.constant dense<0.000000e+00> : vector<1xf32>
    %46 = vector.multi_reduction <add>, %45, %cst_17 [1, 2] : vector<1x8x16xf32> to vector<1xf32>
    %47 = vector.shape_cast %46 : vector<1xf32> to vector<1x1x1xf32>
    %48 = vector.extract %47[0, 0, 0] : f32 from vector<1x1x1xf32>
    %cst_18 = arith.constant 0.000000e+00 : f32
    %49 = arith.subf %cst_18, %40 : f32
    %50 = vector.broadcast %49 : f32 to vector<1x1xf32>
    %51 = math.exp %50 : vector<1x1xf32>
    %52 = vector.broadcast %48 : f32 to vector<1x1xf32>
    %53 = arith.mulf %52, %51 : vector<1x1xf32>
    %54 = vector.shape_cast %53 : vector<1x1xf32> to vector<1x1x1xf32>
    %cst_19 = arith.constant dense<0.000000e+00> : vector<1xf32>
    %55 = vector.multi_reduction <add>, %54, %cst_19 [1, 2] : vector<1x1x1xf32> to vector<1xf32>
    %56 = vector.shape_cast %55 : vector<1xf32> to vector<1x1x1xf32>
    %57 = vector.extract %56[0, 0, 0] : f32 from vector<1x1x1xf32>
    %cst_20 = arith.constant 1.83787704 : f32
    %58 = arith.addf %cst_20, %40 : f32
    %cst_21 = arith.constant 1.280000e+02 : f32
    %59 = arith.mulf %cst_21, %58 : f32
    %60 = arith.addf %57, %59 : f32
    %cst_22 = arith.constant -5.000000e-01 : f32
    %61 = arith.mulf %cst_22, %60 : f32
    %cst_23 = arith.constant 6.250000e-02 : f32
    %62 = arith.mulf %61, %cst_23 : f32
    %c0_24 = arith.constant 0 : index
    %63 = memref.load %arg4[%c0_24] : memref<2xf32, #tpu.memory_space<smem>>
    memref.store %62, %arg4[%c0_24] : memref<2xf32, #tpu.memory_space<smem>>
    %cst_25 = arith.constant 1.000000e+00 : f32
    %64 = vector.broadcast %cst_25 : f32 to vector<8x128xf32>
    %65 = arith.addf %64, %20 : vector<8x128xf32>
    %66 = arith.mulf %15, %15 : vector<8x128xf32>
    %67 = arith.subf %65, %66 : vector<8x128xf32>
    %68 = arith.mulf %23, %23 : vector<8x128xf32>
    %69 = arith.subf %67, %68 : vector<8x128xf32>
    %70 = vector.shape_cast %69 : vector<8x128xf32> to vector<1x8x128xf32>
    %cst_26 = arith.constant dense<0.000000e+00> : vector<1xf32>
    %71 = vector.multi_reduction <add>, %70, %cst_26 [1, 2] : vector<1x8x128xf32> to vector<1xf32>
    %72 = vector.shape_cast %71 : vector<1xf32> to vector<1x1x1xf32>
    %73 = vector.extract %72[0, 0, 0] : f32 from vector<1x1x1xf32>
    %cst_27 = arith.constant -5.000000e-01 : f32
    %74 = arith.mulf %cst_27, %73 : f32
    %cst_28 = arith.constant 1.250000e-01 : f32
    %75 = arith.mulf %74, %cst_28 : f32
    %c1 = arith.constant 1 : index
    %76 = memref.load %arg4[%c1] : memref<2xf32, #tpu.memory_space<smem>>
    memref.store %75, %arg4[%c1] : memref<2xf32, #tpu.memory_space<smem>>
    return
  }
}

</mosaic_0001>

<bundles_post_ra>
// kernel: vae_forward.1
= control target key start
LH: loop header
LB: loop body
LE: loop exit
PB: predicated region body
PF: predicated region fallthrough
CT: control target
= control target key end

     0   :  { %11 = vsyncpa [#allocation4], 0  ;;  %s1124_s0 = inlined_call_operand.vmem [shape: f32[8,128], index: 0, kind: input, shape index: {}]   ;;  %s1125_s1 = inlined_call_operand.hbm [shape: bf16[656,128], index: 1, kind: input, shape index: {}]   ;;  %s1126_s2 = inlined_call_operand.<no memory space> [shape: f32[1,1], index: 2, kind: input, shape index: {}]   ;;  %s1127_s3 = inlined_call_operand.hbm [shape: f32[8,128], index: 3, kind: output, shape index: {0}]   ;;  %s1128_s4 = inlined_call_operand.vmem [shape: f32[2], index: 4, kind: output, shape index: {1}]  }
   0x1   :  { %12 = vsyncpa [#allocation5], 0 }
   0x2   :  { %13 = vsyncpa [#allocation6], 0  ;;  %s984_s15 = smov [#allocation3]   ;;  %s922_s19 = scalar_lea.hbm %s1125_s1, 5248 }
   0x3   :  { %s21_s16 = sshll.u32 %s984_s15, 4  ;;  %p923_p0 = scmp.ne.s32.totalorder %s1125_s1, %s922_s19  ;;  %s22_s16 = int_to_ptr.vmem [resolvable:$true] %s21_s16 }
   0x4   :  { %p926_p1 = scmp.lt.u32.totalorder %s922_s19, %s1125_s1 }
   0x6   :  { %p928_p2 = pnand %p926_p1, %p923_p0 }
   0x8   :  { %931 = shalt.err (!%p928_p2)
}
   0x9   :  { %s932_s24 = scalar_lea.vmem %s22_s16, 5248  ;;  %p937_p4 = scmp.lt.s32.totalorder %s22_s16, %s22_s16 }
   0xa   :  { %p933_p3 = scmp.ne.s32.totalorder %s22_s16, %s932_s24  ;;  %p938_p5 = scmp.lt.s32.totalorder %s932_s24, %s932_s24 }
   0xc   :  { %p939_p6 = por %p938_p5, %p937_p4 }
   0xe   :  { %p940_p7 = pnand %p939_p6, %p933_p3 }
  0x10   :  { %943 = shalt.err (!%p940_p7)
}
  0x11   :  { %s985_s25 = smov 64   ;;  %s986_s26 = smov 4  }
  0x12   :  { %27 = dma.hbm_to_vmem [thread:$0]  %s1125_s1, 5248, %s22_s16, [#allocation4], %s985_s25, %s985_s25, %s986_s26  }
  0x13   :  { %978 = dma.done.wait [#allocation4], 5248  }
  0x14   :  { %979 = vsyncadd [#allocation4], 4294962048  ;;  %v987_v0 = vmov 0.0   ;;  %vm988_vm0 = vmmov 0   ;;  %v874_v1 = vld [vmem:[#allocation3] sm:$0xff]   ;;  %v875_v2 = vld [vmem:[#allocation3 + $0x8] sm:$0xff]   ;;  %v54_v27 = vlaneseq }
  0x15   :  { %759 = vmatprep.subr.bf16.mxu0 %v987_v0  ;;  %775 = vmatprep.mubr.msk.bf16.mxu0 %vm988_vm0, %v987_v0  ;;  %v876_v3 = vld [vmem:[#allocation3 + $0x10] sm:$0xff]   ;;  %v882_v4 = vld [vmem:[#allocation3 + $0x40] sm:$0xff]   ;;  %v877_v5 = vld [vmem:[#allocation3 + $0x18] sm:$0xff]   ;;  %s990_s30 = smov 120   ;;  %vm600_vm1 = vcmask 130048   ;;  %s991_s5 = smov [#allocation7]  }
  0x16   :  { %779 = vmatprep.subr.bf16.mxu1 %v987_v0  ;;  %795 = vmatprep.mubr.msk.bf16.mxu1 %vm988_vm0, %v987_v0  ;;  %v884_v6 = vld [vmem:[#allocation3 + $0x48] sm:$0xff]   ;;  %v878_v7 = vld [vmem:[#allocation3 + $0x20] sm:$0xff]   ;;  %v886_v8 = vld [vmem:[#allocation3 + $0x50] sm:$0xff]   ;;  %v1069_v28 = vshrl.u32 %v54_v27, 7  ;;  %s650_s6 = sshll.u32 %s991_s5, 4  ;;  %s651_s6 = int_to_ptr.vmem [resolvable:$true] %s650_s6 }
  0x17   :  { %760 = vmatpush3.bf16.msra.mxu0 %v874_v1  ;;  %780 = vmatpush3.bf16.msra.mxu1 %v882_v4  ;;  %v879_v9 = vld [vmem:[#allocation3 + $0x28] sm:$0xff]   ;;  %v888_v10 = vld [vmem:[#allocation3 + $0x58] sm:$0xff]   ;;  %v880_v11 = vld [vmem:[#allocation3 + $0x30] sm:$0xff]   ;;  %s944_s7 = scalar_lea.vmem %s651_s6, 128  ;;  %p949_p9 = scmp.lt.s32.totalorder %s651_s6, %s651_s6 }
  0x18   :  { %761 = vmatprep.subr.bf16.mxu0 %v987_v0  ;;  %781 = vmatprep.subr.bf16.mxu1 %v987_v0  ;;  %v881_v12 = vld [vmem:[#allocation3 + $0x38] sm:$0xff]   ;;  %v1048_v13 = vld [vmem:[%s1124_s0] sm:$0xff]  ;;  %v885_v16 = vld [vmem:[#allocation3 + $0x88] sm:$0xff]   ;;  %v56_v31 = vsub.s32 0, %v1069_v28  ;;  %v166_v52 = vsub.s32 1, %v1069_v28  ;;  %v274_v53 = vsub.s32 2, %v1069_v28  ;;  %p945_p8 = scmp.ne.s32.totalorder %s651_s6, %s944_s7  ;;  %p950_p10 = scmp.lt.s32.totalorder %s944_s7, %s944_s7 }
  0x19   :  { %v883_v14 = vld [vmem:[#allocation3 + $0x80] sm:$0xff]   ;;  %v35_v15 = vpack.c.bf16 %v1048_v13, %v1048_v13  ;;  %v887_v17 = vld [vmem:[#allocation3 + $0x90] sm:$0xff]   ;;  %v889_v18 = vld [vmem:[#allocation3 + $0x98] sm:$0xff]   ;;  %s989_s0 = smov 8  }
  0x1a   :  { %v890_v19 = vld [vmem:[#allocation3 + $0x60] sm:$0xff]   ;;  %v892_v21 = vld [vmem:[#allocation3 + $0x68] sm:$0xff]   ;;  %v894_v23 = vld [vmem:[#allocation3 + $0x70] sm:$0xff]   ;;  %p951_p11 = por %p950_p10, %p949_p9 }
  0x1b   :  { %762 = vmatpush3.bf16.msra.mxu0 %v875_v2  ;;  %782 = vmatpush3.bf16.msra.mxu1 %v884_v6  ;;  %v891_v20 = vld [vmem:[#allocation3 + $0xa0] sm:$0xff]   ;;  %v893_v22 = vld [vmem:[#allocation3 + $0xa8] sm:$0xff]   ;;  %v895_v24 = vld [vmem:[#allocation3 + $0xb0] sm:$0xff]  }
  0x1c   :  { %763 = vmatprep.subr.bf16.mxu0 %v987_v0  ;;  %783 = vmatprep.subr.bf16.mxu1 %v987_v0  ;;  %v896_v25 = vld [vmem:[#allocation3 + $0x78] sm:$0xff]   ;;  %v36_v29 = vld [vmem:[#allocation3 + $0x140] sm:$0xf]  ;;  %v899_v41 = vld [vmem:[#allocation3 + $0xc8] sm:$0xff]   ;;  %p952_p12 = pnand %p951_p11, %p945_p8 }
  0x1d   :  { %v897_v26 = vld [vmem:[#allocation3 + $0xb8] sm:$0xff]   ;;  %v1071_v30 = vunpack.c.l.bf16 %v36_v29  ;;  %v898_v39 = vld [vmem:[#allocation3 + $0xc0] sm:$0xff]   ;;  %v900_v42 = vld [vmem:[#allocation3 + $0xd0] sm:$0xff]   ;;  %v498_v29 = vsub.s32 4, %v1069_v28 }
  0x1e   :  { %v901_v43 = vld [vmem:[#allocation3 + $0xd8] sm:$0xff]   ;;  %v902_v44 = vld [vmem:[#allocation3 + $0xe0] sm:$0xff]   ;;  %v903_v45 = vld [vmem:[#allocation3 + $0xe8] sm:$0xff]  }
  0x1f   :  { %764 = vmatpush3.bf16.msra.mxu0 %v876_v3  ;;  %784 = vmatpush3.bf16.msra.mxu1 %v886_v8  ;;  %v57_v32 = vrot.slane %v1071_v30, %v56_v31  ;;  %v904_v46 = vld [vmem:[#allocation3 + $0xf0] sm:$0xff]   ;;  %v905_v47 = vld [vmem:[#allocation3 + $0xf8] sm:$0xff]   ;;  %v906_v48 = vld [vmem:[#allocation3 + $0x100] sm:$0xff]   ;;  %v167_v54 = vrot.slane %v1071_v30, %v166_v52  ;;  %v275_v55 = vrot.slane %v1071_v30, %v274_v53 }
  0x20   :  { %765 = vmatprep.subr.bf16.mxu0 %v987_v0  ;;  %785 = vmatprep.subr.bf16.mxu1 %v987_v0  ;;  %v907_v49 = vld [vmem:[#allocation3 + $0x108] sm:$0xff]   ;;  %v908_v50 = vld [vmem:[#allocation3 + $0x110] sm:$0xff]   ;;  %v909_v51 = vld [vmem:[#allocation3 + $0x118] sm:$0xff]   ;;  %v499_v31 = vrot.slane %v1071_v30, %v498_v29 }
  0x23   :  { %766 = vmatpush3.bf16.msra.mxu0 %v877_v5  ;;  %786 = vmatpush3.bf16.msra.mxu1 %v888_v10 }
  0x24   :  { %767 = vmatprep.subr.bf16.mxu0 %v987_v0  ;;  %787 = vmatprep.subr.bf16.mxu1 %v987_v0 }
  0x27   :  { %768 = vmatpush3.bf16.msra.mxu0 %v878_v7  ;;  %788 = vmatpush3.bf16.msra.mxu1 %v890_v19  ;;  %v388_v19 = vsub.s32 3, %v1069_v28 }
  0x28   :  { %769 = vmatprep.subr.bf16.mxu0 %v987_v0  ;;  %789 = vmatprep.subr.bf16.mxu1 %v987_v0 }
  0x2b   :  { %770 = vmatpush3.bf16.msra.mxu0 %v879_v9  ;;  %790 = vmatpush3.bf16.msra.mxu1 %v892_v21 }
  0x2c   :  { %771 = vmatprep.subr.bf16.mxu0 %v987_v0  ;;  %791 = vmatprep.subr.bf16.mxu1 %v987_v0 }
  0x2f   :  { %772 = vmatpush3.bf16.msra.mxu0 %v880_v11  ;;  %792 = vmatpush3.bf16.msra.mxu1 %v894_v23 }
  0x30   :  { %773 = vmatprep.subr.bf16.mxu0 %v987_v0  ;;  %793 = vmatprep.subr.bf16.mxu1 %v987_v0 }
  0x33   :  { %774 = vmatpush3.bf16.msra.mxu0 %v881_v12  ;;  %794 = vmatpush3.bf16.msra.mxu1 %v896_v25 }
  0x34   :  { %799 = vmatprep.subr.bf16.mxu0 %v987_v0  ;;  %819 = vmatprep.subr.bf16.mxu1 %v987_v0 }
  0x36   :  { %776 = vmatmul.mubr.bf16.vlgmr.msra.gmra.mrb[0].mxu0 %v35_v15  ;;  %v910_v15 = vld [vmem:[#allocation3 + $0x120] sm:$0xff]  }
  0x37   :  { %800 = vmatpush3.bf16.msra.mxu0 %v883_v14  ;;  %815 = vmatprep.mubr.msk.bf16.mxu0 %vm988_vm0, %v987_v0 }
  0x38   :  { %801 = vmatprep.subr.bf16.mxu0 %v987_v0 }
  0x3b   :  { %802 = vmatpush3.bf16.msra.mxu0 %v885_v16  ;;  %v911_v16 = vld [vmem:[#allocation3 + $0x128] sm:$0xff]  }
  0x3c   :  { %803 = vmatprep.subr.bf16.mxu0 %v987_v0 }
  0x3f   :  { %804 = vmatpush3.bf16.msra.mxu0 %v887_v17  ;;  %v912_v17 = vld [vmem:[#allocation3 + $0x130] sm:$0xff]  }
  0x40   :  { %805 = vmatprep.subr.bf16.mxu0 %v987_v0 }
  0x43   :  { %806 = vmatpush3.bf16.msra.mxu0 %v889_v18  ;;  %v913_v18 = vld [vmem:[#allocation3 + $0x138] sm:$0xff]  }
  0x44   :  { %807 = vmatprep.subr.bf16.mxu0 %v987_v0 }
  0x47   :  { %808 = vmatpush3.bf16.msra.mxu0 %v891_v20  ;;  %v389_v20 = vrot.slane %v1071_v30, %v388_v19 }
  0x48   :  { %809 = vmatprep.subr.bf16.mxu0 %v987_v0 }
  0x4b   :  { %810 = vmatpush3.bf16.msra.mxu0 %v893_v22 }
  0x4c   :  { %811 = vmatprep.subr.bf16.mxu0 %v987_v0 }
  0x4f   :  { %812 = vmatpush3.bf16.msra.mxu0 %v895_v24 }
  0x50   :  { %813 = vmatprep.subr.bf16.mxu0 %v987_v0 }
  0x53   :  { %814 = vmatpush3.bf16.msra.mxu0 %v897_v26 }
  0x54   :  { %839 = vmatprep.subr.bf16.mxu0 %v987_v0 }
 0x109   :  { %v140_v33 = vpop.f32.mrb[0].mxu0 }
 0x10a   :  { %v141_v34 = vadd.f32 %v140_v33, %v57_v32  ;;  %v777_v35 = vpop.f32.mrb[1].mxu0 }
 0x10b   :  { %v143_v36 = vpop.f32.mrb[2].mxu0 }
 0x10c   :  { %914 = vtanh.f32 %v141_v34  ;;  %v778_v37 = vpop.f32.mrb[3].mxu0 }
 0x116   :  { %v915_v38 = vpop.eup %914 }
 0x117   :  { %v147_v40 = vpack.c.bf16 %v915_v38, %v915_v38 }
 0x119   :  { %796 = vmatmul.mubr.bf16.vlgmr.msra.gmra.mrb[0].mxu1 %v147_v40  ;;  %816 = vmatmul.mubr.bf16.vlgmr.msra.gmra.mrb[4].mxu0 %v147_v40 }
 0x11a   :  { %820 = vmatpush3.bf16.msra.mxu1 %v898_v39  ;;  %835 = vmatprep.mubr.msk.bf16.mxu1 %vm988_vm0, %v987_v0 }
 0x11b   :  { %821 = vmatprep.subr.bf16.mxu1 %v987_v0  ;;  %855 = vmatprep.mubr.msk.bf16.mxu0 %vm988_vm0, %v987_v0 }
 0x11c   :  { %840 = vmatpush3.bf16.msra.mxu0 %v906_v48 }
 0x11d   :  { %841 = vmatprep.subr.bf16.mxu0 %v987_v0 }
 0x11e   :  { %822 = vmatpush3.bf16.msra.mxu1 %v899_v41 }
 0x11f   :  { %823 = vmatprep.subr.bf16.mxu1 %v987_v0 }
 0x120   :  { %842 = vmatpush3.bf16.msra.mxu0 %v907_v49 }
 0x121   :  { %843 = vmatprep.subr.bf16.mxu0 %v987_v0 }
 0x122   :  { %824 = vmatpush3.bf16.msra.mxu1 %v900_v42 }
 0x123   :  { %825 = vmatprep.subr.bf16.mxu1 %v987_v0 }
 0x124   :  { %844 = vmatpush3.bf16.msra.mxu0 %v908_v50 }
 0x125   :  { %845 = vmatprep.subr.bf16.mxu0 %v987_v0 }
 0x126   :  { %826 = vmatpush3.bf16.msra.mxu1 %v901_v43 }
 0x127   :  { %827 = vmatprep.subr.bf16.mxu1 %v987_v0 }
 0x128   :  { %846 = vmatpush3.bf16.msra.mxu0 %v909_v51 }
 0x129   :  { %847 = vmatprep.subr.bf16.mxu0 %v987_v0 }
 0x12a   :  { %828 = vmatpush3.bf16.msra.mxu1 %v902_v44 }
 0x12b   :  { %829 = vmatprep.subr.bf16.mxu1 %v987_v0 }
 0x12c   :  { %848 = vmatpush3.bf16.msra.mxu0 %v910_v15 }
 0x12d   :  { %849 = vmatprep.subr.bf16.mxu0 %v987_v0 }
 0x12e   :  { %830 = vmatpush3.bf16.msra.mxu1 %v903_v45 }
 0x12f   :  { %831 = vmatprep.subr.bf16.mxu1 %v987_v0 }
 0x130   :  { %850 = vmatpush3.bf16.msra.mxu0 %v911_v16 }
 0x131   :  { %851 = vmatprep.subr.bf16.mxu0 %v987_v0 }
 0x132   :  { %832 = vmatpush3.bf16.msra.mxu1 %v904_v46 }
 0x133   :  { %833 = vmatprep.subr.bf16.mxu1 %v987_v0 }
 0x134   :  { %852 = vmatpush3.bf16.msra.mxu0 %v912_v17 }
 0x135   :  { %853 = vmatprep.subr.bf16.mxu0 %v987_v0 }
 0x136   :  { %834 = vmatpush3.bf16.msra.mxu1 %v905_v47 }
 0x138   :  { %854 = vmatpush3.bf16.msra.mxu0 %v913_v18 }
 0x1ec   :  { %v250_v56 = vpop.f32.mrb[0].mxu1  ;;  %v358_v57 = vpop.f32.mrb[4].mxu0 }
 0x1ed   :  { %v251_v58 = vadd.f32 %v250_v56, %v167_v54  ;;  %v359_v59 = vadd.f32 %v358_v57, %v275_v55  ;;  %v797_v60 = vpop.f32.mrb[1].mxu1  ;;  %v817_v61 = vpop.f32.mrb[5].mxu0 }
 0x1ee   :  { %v253_v62 = vpop.f32.mrb[2].mxu1  ;;  %v361_v63 = vpop.f32.mrb[6].mxu0 }
 0x1ef   :  { %v627_v1 = vmul.f32 %v251_v58, %v251_v58  ;;  %v364_v2 = vmul.f32 0.5, %v359_v59  ;;  %v626_v3 = vadd.f32 1.0, %v359_v59  ;;  %v798_v4 = vpop.f32.mrb[3].mxu1  ;;  %v818_v5 = vpop.f32.mrb[7].mxu0 }
 0x1f1   :  { %v365_v6 = vmul.f32 1.442695, %v364_v2  ;;  %v628_v7 = vsub.f32 %v626_v3, %v627_v1 }
 0x1f3   :  { %916 = vpow2.f32 %v365_v6 }
 0x1fd   :  { %v917_v8 = vpop.eup %916 }
 0x1fe   :  { %v367_v9 = vmul.f32 %v917_v8, %v1048_v13  ;;  %v629_v10 = vmul.f32 %v917_v8, %v917_v8 }
 0x200   :  { %v368_v11 = vadd.f32 %v367_v9, %v251_v58  ;;  %v630_v12 = vsub.f32 %v628_v7, %v629_v10 }
 0x202   :  { %v369_v14 = vpack.c.bf16 %v368_v11, %v368_v11 }
 0x204   :  { %836 = vmatmul.mubr.bf16.vlgmr.msra.gmra.mrb[4].mxu1 %v369_v14 }
 0x2d7   :  { %v472_v21 = vpop.f32.mrb[4].mxu1 }
 0x2d8   :  { %v473_v22 = vadd.f32 %v472_v21, %v389_v20  ;;  %v837_v23 = vpop.f32.mrb[5].mxu1 }
 0x2d9   :  { %v475_v24 = vpop.f32.mrb[6].mxu1 }
 0x2da   :  { %918 = vtanh.f32 %v473_v22  ;;  %v838_v25 = vpop.f32.mrb[7].mxu1 }
 0x2e4   :  { %v919_v26 = vpop.eup %918 }
 0x2e5   :  { %v479_v27 = vpack.c.bf16 %v919_v26, %v919_v26 }
 0x2e7   :  { %856 = vmatmul.mubr.bf16.vlgmr.msra.gmra.mrb[8].mxu0 %v479_v27 }
 0x3ba   :  { %v582_v0 = vpop.f32.mrb[8].mxu0 }
 0x3bb   :  { %v583_v32 = vadd.f32 %v582_v0, %v499_v31  ;;  %v857_v33 = vpop.f32.mrb[9].mxu0 }
 0x3bc   :  { %v585_v34 = vpop.f32.mrb[10].mxu0 }
 0x3bd   :  { %588 = vst [vmem:[#allocation7] sm:$0xff] %v583_v32  ;;  %591 = vrot.lane.b32.xlu0 %v583_v32, %s989_s0  ;;  %v858_v35 = vpop.f32.mrb[11].mxu0 }
 0x42f   :  { %v592_v36 = vpop.permute.xlu0 %591 }
 0x430   :  { %v594_v37 = vsub.f32 %v1048_v13, %v592_v36 }
 0x432   :  { %v595_v38 = vmul.f32 %v594_v37, %v594_v37 }
 0x434   :  { %597 = vrot.lane.b32.xlu0 %v595_v38, %s990_s30 }
 0x4a6   :  { %v598_v39 = vpop.permute.xlu0 %597 }
 0x4a7   :  { %v601_v40 = vsel %vm600_vm1, %v598_v39, 0.0 }
 0x4a8   :  { %602 = vadd.xlane.f32.xlu1 %v601_v40 }
 0x4ac   :  { %631 = vadd.xlane.f32.xlu1 %v630_v12 }
 0x4ad   :  { %955 = shalt.err (!%p952_p12)
}
 0x4ae   :  { %s956_s10 = scalar_lea.hbm %s1127_s3, 128 }
 0x4af   :  { %p957_p13 = scmp.ne.s32.totalorder %s1127_s3, %s956_s10  ;;  %p960_p0 = scmp.lt.u32.totalorder %s956_s10, %s1127_s3 }
 0x4b1   :  { %p962_p1 = pnand %p960_p0, %p957_p13 }
 0x4b3   :  { %965 = shalt.err (!%p962_p1)
}
 0x4b4   :  { %653 = dma.vmem_to_hbm [thread:$0]  %s651_s6, 128, %s1127_s3, [#allocation5]  }
 0x4b5   :  { %s611_s19 = ssub.f32 0.0, %s1126_s2  ;;  %s660_s27 = sshll.u32 %s1128_s4, 4  ;;  %s661_s27 = int_to_ptr.vmem [resolvable:$true] %s660_s27 }
 0x4b6   :  { %s619_s22 = sadd.f32 1.837877, %s1126_s2  ;;  %s966_s6 = scalar_lea.vmem %s661_s27, 16 }
 0x4b7   :  { %v612_v46 = vstv %s611_s19  ;;  %p967_p2 = scmp.ne.s32.totalorder %s661_s27, %s966_s6  ;;  %p971_p3 = scmp.lt.s32.totalorder %s661_s27, %s661_s27 }
 0x4b8   :  { %v613_v48 = vmul.f32 1.442695, %v612_v46  ;;  %s620_s23 = smul.f32 128.0, %s619_s22  ;;  %p972_p4 = scmp.lt.s32.totalorder %s966_s6, %s966_s6 }
 0x4ba   :  { %920 = vpow2.f32 %v613_v48  ;;  %p973_p5 = por %p972_p4, %p971_p3 }
 0x4bc   :  { %p974_p6 = pnand %p973_p5, %p967_p2 }
 0x4c4   :  { %v921_v52 = vpop.eup %920 }
 0x535   :  { %v603_v13 = vpop.xlane.xlu1 %602 }
 0x536   :  { %v604_v28 = vrot.slane %v603_v13, 4 }
 0x538   :  { %v605_v30 = vadd.f32 %v604_v28, %v603_v13 }
 0x539   :  { %v632_v45 = vpop.xlane.xlu1 %631 }
 0x53a   :  { %v606_v41 = vrot.slane %v605_v30, 2  ;;  %v633_v47 = vrot.slane %v632_v45, 4 }
 0x53c   :  { %v607_v42 = vadd.f32 %v606_v41, %v605_v30  ;;  %v634_v49 = vadd.f32 %v633_v47, %v632_v45 }
 0x53e   :  { %v608_v43 = vrot.slane %v607_v42, 1  ;;  %v635_v50 = vrot.slane %v634_v49, 2 }
 0x540   :  { %v609_v44 = vadd.f32 %v608_v43, %v607_v42  ;;  %v636_v51 = vadd.f32 %v635_v50, %v634_v49 }
 0x542   :  { %859 = vpush %v609_v44  ;;  %v637_v53 = vrot.slane %v636_v51, 1 }
 0x544   :  { %v638_v56 = vadd.f32 %v637_v53, %v636_v51 }
 0x573   :  { %s860_s3 = spop %859 }
 0x574   :  { %v615_v54 = vstv %s860_s3 }
 0x575   :  { %v616_v55 = vmul.f32 %v921_v52, %v615_v54 }
 0x577   :  { %861 = vpush %v616_v55 }
 0x578   :  { %863 = vpush %v638_v56 }
 0x5a8   :  { %s862_s24 = spop %861 }
 0x5a9   :  { %s621_s28 = sadd.f32 %s862_s24, %s620_s23  ;;  %s864_s1 = spop %863 }
 0x5aa   :  { %s640_s29 = smul.f32 -0.5, %s864_s1 }
 0x5ab   :  { %s622_s0 = smul.f32 -0.5, %s621_s28 }
 0x5ac   :  { %s641_s30 = smul.f32 0.125, %s640_s29 }
 0x5ad   :  { %s623_s5 = smul.f32 0.0625, %s622_s0 }
 0x5ae   :  { %643 = sst [smem:[#allocation8 + $0x1]] %s641_s30 }
 0x5af   :  { %625 = sst [smem:[#allocation8]] %s623_s5 }
 0x5b0   :  { %977 = shalt.err (!%p974_p6)
}
 0x5b1   :  { %s992_s2 = smov [#allocation8]  }
 0x5b2   :  { %663 = dma.smem_to_vmem %s992_s2, 16, %s661_s27, [#allocation6]  }
 0x5b3   :  { %980 = dma.done.wait [#allocation5], 128  }
 0x5b4   :  { %981 = vsyncadd [#allocation5], 4294967168 }
 0x5b5   :  { %982 = dma.done.wait [#allocation6], 16  }
 0x5b6   :  { %983 = vsyncadd [#allocation6], 4294967280 }
 0x5b7   :  { %670 = sfence }
 0x5b8   :  { %671 = vsyncpa [#allocation4], 1 }
 0x5b9   :  { %672 = vsyncpa [#allocation5], 1 }
 0x5ba   :  { %673 = vsyncpa [#allocation6], 1 }

</bundles_post_ra>
